<compile_context>
chip_gen: v6e
topology: v6e:2x2x1
jax: 0.10.0
libtpu: 0.0.40
codegen_flags: <defaults>
</compile_context>

<pallas_src>
import functools

import jax
import jax.numpy as jnp
from jax.experimental import pallas as pl
from jax.experimental.pallas import tpu as pltpu

_LANE = 128


def _round_up(n, m):
    return ((n + m - 1) // m) * m


def _device_has_bf16_eup():
    """True on TPU generations with a bf16 transcendental path (v6e / v7x)."""
    try:
        kind = jax.devices()[0].device_kind.lower()
    except Exception:
        return False
    if "tpu" not in kind:
        return False
    return not any(v in kind for v in ("v2", "v3", "v4", "v5"))


def actor_kernel(x_ref, w1_ref, b1_ref, w2_ref, b2_ref,
                 w3_ref, b3_ref, w4_ref, b4_ref, o_ref,
                 *, action_size, bf16_tanh):
    # Whole MLP hot path for one batch tile.
    # bf16 MXU matmuls with f32 accumulation; bias adds and softmax in f32.
    x = x_ref[...].astype(jnp.bfloat16)                 # in-kernel cast (VPU)

    def act(z):                                         # z: f32 acc + bias
        if bf16_tanh:
            # v6e/v7x: bf16 tanh on the EUP (2x throughput); next matmul
            # consumes bf16 anyway, so precision is unchanged.
            return jnp.tanh(z.astype(jnp.bfloat16))
        return jnp.tanh(z).astype(jnp.bfloat16)

    h = act(jnp.dot(x, w1_ref[...],
                    preferred_element_type=jnp.float32) + b1_ref[...])
    h = act(jnp.dot(h, w2_ref[...],
                    preferred_element_type=jnp.float32) + b2_ref[...])
    h = act(jnp.dot(h, w3_ref[...],
                    preferred_element_type=jnp.float32) + b3_ref[...])
    logits = (jnp.dot(h, w4_ref[...],
                      preferred_element_type=jnp.float32) + b4_ref[...])

    # Numerically-stable softmax on the lane-dense (tile, 128) slab.
    # Padded logit lanes carry bias -1e30 -> exp underflows to exactly 0.
    m = jnp.max(logits, axis=-1, keepdims=True)
    e = jnp.exp(logits - m)
    s = jnp.sum(e, axis=-1, keepdims=True)
    probs = e / s                                       # exact normalization

    # Store only the real action columns (masked vst, ~16x less HBM traffic).
    o_ref[...] = probs[:, :action_size]


def prepare_actor_params(params):
    """One-time packing: bf16 weights, lane-padded (to 128) w4/b4.

    Returns (packed_params, action_size). Do this once, outside the hot path.
    """
    A = params["w4"].shape[1]
    A_pad = _round_up(max(A, _LANE), _LANE)
    packed = {
        "w1": params["w1"].astype(jnp.bfloat16),
        "b1": params["b1"].astype(jnp.float32),
        "w2": params["w2"].astype(jnp.bfloat16),
        "b2": params["b2"].astype(jnp.float32),
        "w3": params["w3"].astype(jnp.bfloat16),
        "b3": params["b3"].astype(jnp.float32),
        "w4": jnp.pad(params["w4"],
                      ((0, 0), (0, A_pad - A))).astype(jnp.bfloat16),
        # Padded logit columns get -1e30 so softmax assigns them ~0 prob.
        "b4": jnp.pad(params["b4"].astype(jnp.float32),
                      ((0, 0), (0, A_pad - A)), constant_values=-1e30),
    }
    return packed, A


@functools.partial(jax.jit,
                   static_argnames=("action_size", "batch_tile", "bf16_tanh"))
def _actor_forward_impl(x, packed, *, action_size, batch_tile, bf16_tanh):
    B, S = x.shape
    A = action_size

    # Batch tile: multiple of 8 (f32 sublane), never bigger than the padded
    # batch -> small batches run as a single grid step (v5e/v6e single TC);
    # large batches naturally give a multi-step "parallel" grid for v7x.
    tile = _round_up(min(batch_tile, _round_up(B, 8)), 8)
    B_pad = _round_up(B, tile)

    x_p = x.astype(jnp.float32)
    if B_pad != B:
        x_p = jnp.pad(x_p, ((0, B_pad - B), (0, 0)))

    w1, b1 = packed["w1"], packed["b1"]
    w2, b2 = packed["w2"], packed["b2"]
    w3, b3 = packed["w3"], packed["b3"]
    w4, b4 = packed["w4"], packed["b4"]

    def resident(shape):
        # Full-array block + constant index map: DMA'd once, VMEM-resident
        # across all grid steps (~0.27 MB of bf16 weights).
        return pl.BlockSpec(shape, lambda i: (0, 0))

    in_specs = [
        pl.BlockSpec((tile, S), lambda i: (i, 0)),       # streamed x tile (f32)
        resident(w1.shape), resident(b1.shape),
        resident(w2.shape), resident(b2.shape),
        resident(w3.shape), resident(b3.shape),
        resident(w4.shape), resident(b4.shape),
    ]
    # Un-padded output: (tile, A) block, A equals the full last dim.
    out_spec = pl.BlockSpec((tile, A), lambda i: (i, 0))

    kernel = functools.partial(actor_kernel,
                               action_size=A, bf16_tanh=bf16_tanh)

    out = pl.pallas_call(
        kernel,
        out_shape=jax.ShapeDtypeStruct((B_pad, A), jnp.float32),
        grid_spec=pltpu.PrefetchScalarGridSpec(
            num_scalar_prefetch=0,
            grid=(B_pad // tile,),
            in_specs=in_specs,
            out_specs=out_spec,
        ),
        compiler_params=pltpu.CompilerParams(
            dimension_semantics=("parallel",),           # megacore on v7x
            vmem_limit_bytes=48 * 1024 * 1024,           # fits v7x 64 MiB/TC
        ),
    )(x_p, w1, b1, w2, b2, w3, b3, w4, b4)

    if B_pad != B:
        out = out[:B]
    return out


def actor_forward(x, packed, action_size, batch_tile=1024, bf16_tanh=None):
    """x: (B, state_size) f32; packed: output of prepare_actor_params.

    Returns (B, action_size) f32 action probabilities (softmax over actions).
    """
    if bf16_tanh is None:
        bf16_tanh = _device_has_bf16_eup()
    return _actor_forward_impl(x, packed, action_size=action_size,
                               batch_tile=batch_tile, bf16_tanh=bf16_tanh)


def init_actor_params(key, state_size, action_size):
    """Deterministic init mimicking nn.Linear default (uniform +-1/sqrt(fan_in)).
    Weights are stored as (in, out) = W_pytorch.T."""
    dims = [(state_size, 128), (128, 512), (512, 128), (128, action_size)]
    params = {}
    for idx, (fan_in, fan_out) in enumerate(dims, start=1):
        key, kw, kb = jax.random.split(key, 3)
        bound = 1.0 / (fan_in ** 0.5)
        params[f"w{idx}"] = jax.random.uniform(
            kw, (fan_in, fan_out), jnp.float32, -bound, bound)
        params[f"b{idx}"] = jax.random.uniform(
            kb, (1, fan_out), jnp.float32, -bound, bound)
    return params


def actor_ref(x, params):
    """Pure-JAX f32 reference (matches the PyTorch forward)."""
    h = jnp.tanh(x @ params["w1"] + params["b1"])
    h = jnp.tanh(h @ params["w2"] + params["b2"])
    h = jnp.tanh(h @ params["w3"] + params["b3"])
    logits = h @ params["w4"] + params["b4"]
    return jax.nn.softmax(logits, axis=-1)


if __name__ == "__main__":
    STATE_SIZE = 32     # small synthetic state dim
    ACTION_SIZE = 8     # small synthetic action dim
    BATCH = 32          # small demo batch -> single grid step (no serial loop)

    key = jax.random.PRNGKey(0)
    key, kx = jax.random.split(key)
    x = jax.random.normal(kx, (BATCH, STATE_SIZE), jnp.float32)
    params = init_actor_params(key, STATE_SIZE, ACTION_SIZE)

    # Pack weights once (bf16 cast + action-lane padding), outside the hot path.
    packed, act_n = prepare_actor_params(params)

    probs = actor_forward(x, packed, act_n)
    probs = jax.block_until_ready(probs)

    ref = actor_ref(x, params)
    assert probs.shape == (BATCH, ACTION_SIZE)
    # bf16 matmuls (and bf16 tanh on v6e/v7x) -> compare against f32 ref loosely.
    assert jnp.allclose(probs, ref, atol=1e-2, rtol=1e-2)
    # Exact divide in the kernel -> rows sum to 1 to f32 precision.
    assert jnp.allclose(jnp.sum(probs, axis=-1), 1.0, atol=1e-3)

    print("KERNEL_OK")
</pallas_src>

<mosaic_0001>
module attributes {stable_mosaic.version = 11 : i64} {
  func.func @actor_kernel(%arg0: i32, %arg1: memref<32x32xf32, #tpu.memory_space<vmem>>, %arg2: memref<32x128xbf16, #tpu.memory_space<vmem>>, %arg3: memref<1x128xf32, #tpu.memory_space<vmem>>, %arg4: memref<128x512xbf16, #tpu.memory_space<vmem>>, %arg5: memref<1x512xf32, #tpu.memory_space<vmem>>, %arg6: memref<512x128xbf16, #tpu.memory_space<vmem>>, %arg7: memref<1x128xf32, #tpu.memory_space<vmem>>, %arg8: memref<128x128xbf16, #tpu.memory_space<vmem>>, %arg9: memref<1x128xf32, #tpu.memory_space<vmem>>, %arg10: memref<32x8xf32, #tpu.memory_space<vmem>>) attributes {dimension_semantics = [#tpu.dimension_semantics<parallel>], iteration_bounds = array<i64: 1>, scalar_prefetch = 0 : i64, scratch_operands = 0 : i64, tpu.core_type = #tpu.core_type<tc>, window_params = [{transform_indices = @transform_0, window_bounds = array<i64: 32, 32>}, {pipeline_mode = #tpu.pipeline_mode<synchronous>, transform_indices = @transform_1, window_bounds = array<i64: 32, 128>}, {pipeline_mode = #tpu.pipeline_mode<synchronous>, transform_indices = @transform_2, window_bounds = array<i64: 1, 128>}, {pipeline_mode = #tpu.pipeline_mode<synchronous>, transform_indices = @transform_3, window_bounds = array<i64: 128, 512>}, {pipeline_mode = #tpu.pipeline_mode<synchronous>, transform_indices = @transform_4, window_bounds = array<i64: 1, 512>}, {pipeline_mode = #tpu.pipeline_mode<synchronous>, transform_indices = @transform_5, window_bounds = array<i64: 512, 128>}, {pipeline_mode = #tpu.pipeline_mode<synchronous>, transform_indices = @transform_6, window_bounds = array<i64: 1, 128>}, {pipeline_mode = #tpu.pipeline_mode<synchronous>, transform_indices = @transform_7, window_bounds = array<i64: 128, 128>}, {pipeline_mode = #tpu.pipeline_mode<synchronous>, transform_indices = @transform_8, window_bounds = array<i64: 1, 128>}, {transform_indices = @transform_9, window_bounds = array<i64: 32, 8>}]} {
    %c0 = arith.constant 0 : index
    %c0_0 = arith.constant 0 : index
    %0 = vector.load %arg1[%c0, %c0_0] : memref<32x32xf32, #tpu.memory_space<vmem>>, vector<32x32xf32>
    %1 = arith.truncf %0 : vector<32x32xf32> to vector<32x32xbf16>
    %c0_1 = arith.constant 0 : index
    %c0_2 = arith.constant 0 : index
    %2 = vector.load %arg2[%c0_1, %c0_2] : memref<32x128xbf16, #tpu.memory_space<vmem>>, vector<32x128xbf16>
    %cst = arith.constant dense<0.000000e+00> : vector<32x128xf32>
    %3 = tpu.matmul %1, %2, %cst {dimension_numbers = #tpu.dot_dimension_numbers<[1], [0], [0], [1], [0, 0, 1, 1], [], []>} : vector<32x32xbf16>, vector<32x128xbf16>, vector<32x128xf32> -> vector<32x128xf32>
    %c0_3 = arith.constant 0 : index
    %c0_4 = arith.constant 0 : index
    %4 = vector.load %arg3[%c0_3, %c0_4] : memref<1x128xf32, #tpu.memory_space<vmem>>, vector<1x128xf32>
    %5 = vector.broadcast %4 : vector<1x128xf32> to vector<32x128xf32>
    %6 = arith.addf %3, %5 : vector<32x128xf32>
    %7 = math.tanh %6 : vector<32x128xf32>
    %8 = arith.truncf %7 : vector<32x128xf32> to vector<32x128xbf16>
    %c0_5 = arith.constant 0 : index
    %c0_6 = arith.constant 0 : index
    %9 = vector.load %arg4[%c0_5, %c0_6] : memref<128x512xbf16, #tpu.memory_space<vmem>>, vector<128x512xbf16>
    %cst_7 = arith.constant dense<0.000000e+00> : vector<32x512xf32>
    %10 = tpu.matmul %8, %9, %cst_7 {dimension_numbers = #tpu.dot_dimension_numbers<[1], [0], [0], [1], [0, 0, 1, 1], [], []>} : vector<32x128xbf16>, vector<128x512xbf16>, vector<32x512xf32> -> vector<32x512xf32>
    %c0_8 = arith.constant 0 : index
    %c0_9 = arith.constant 0 : index
    %11 = vector.load %arg5[%c0_8, %c0_9] : memref<1x512xf32, #tpu.memory_space<vmem>>, vector<1x512xf32>
    %12 = vector.broadcast %11 : vector<1x512xf32> to vector<32x512xf32>
    %13 = arith.addf %10, %12 : vector<32x512xf32>
    %14 = math.tanh %13 : vector<32x512xf32>
    %15 = arith.truncf %14 : vector<32x512xf32> to vector<32x512xbf16>
    %c0_10 = arith.constant 0 : index
    %c0_11 = arith.constant 0 : index
    %16 = vector.load %arg6[%c0_10, %c0_11] : memref<512x128xbf16, #tpu.memory_space<vmem>>, vector<512x128xbf16>
    %cst_12 = arith.constant dense<0.000000e+00> : vector<32x128xf32>
    %17 = tpu.matmul %15, %16, %cst_12 {dimension_numbers = #tpu.dot_dimension_numbers<[1], [0], [0], [1], [0, 0, 1, 1], [], []>} : vector<32x512xbf16>, vector<512x128xbf16>, vector<32x128xf32> -> vector<32x128xf32>
    %c0_13 = arith.constant 0 : index
    %c0_14 = arith.constant 0 : index
    %18 = vector.load %arg7[%c0_13, %c0_14] : memref<1x128xf32, #tpu.memory_space<vmem>>, vector<1x128xf32>
    %19 = vector.broadcast %18 : vector<1x128xf32> to vector<32x128xf32>
    %20 = arith.addf %17, %19 : vector<32x128xf32>
    %21 = math.tanh %20 : vector<32x128xf32>
    %22 = arith.truncf %21 : vector<32x128xf32> to vector<32x128xbf16>
    %c0_15 = arith.constant 0 : index
    %c0_16 = arith.constant 0 : index
    %23 = vector.load %arg8[%c0_15, %c0_16] : memref<128x128xbf16, #tpu.memory_space<vmem>>, vector<128x128xbf16>
    %cst_17 = arith.constant dense<0.000000e+00> : vector<32x128xf32>
    %24 = tpu.matmul %22, %23, %cst_17 {dimension_numbers = #tpu.dot_dimension_numbers<[1], [0], [0], [1], [0, 0, 1, 1], [], []>} : vector<32x128xbf16>, vector<128x128xbf16>, vector<32x128xf32> -> vector<32x128xf32>
    %c0_18 = arith.constant 0 : index
    %c0_19 = arith.constant 0 : index
    %25 = vector.load %arg9[%c0_18, %c0_19] : memref<1x128xf32, #tpu.memory_space<vmem>>, vector<1x128xf32>
    %26 = vector.broadcast %25 : vector<1x128xf32> to vector<32x128xf32>
    %27 = arith.addf %24, %26 : vector<32x128xf32>
    %cst_20 = arith.constant dense<0xFF800000> : vector<32xf32>
    %28 = vector.multi_reduction <maximumf>, %27, %cst_20 [1] : vector<32x128xf32> to vector<32xf32>
    %29 = vector.shape_cast %28 : vector<32xf32> to vector<32x1xf32>
    %30 = vector.broadcast %29 : vector<32x1xf32> to vector<32x128xf32>
    %31 = arith.subf %27, %30 : vector<32x128xf32>
    %32 = math.exp %31 : vector<32x128xf32>
    %cst_21 = arith.constant dense<0.000000e+00> : vector<32xf32>
    %33 = vector.multi_reduction <add>, %32, %cst_21 [1] : vector<32x128xf32> to vector<32xf32>
    %34 = vector.shape_cast %33 : vector<32xf32> to vector<32x1xf32>
    %35 = vector.broadcast %34 : vector<32x1xf32> to vector<32x128xf32>
    %36 = arith.divf %32, %35 : vector<32x128xf32>
    %37 = vector.extract_strided_slice %36 {offsets = [0, 0], sizes = [32, 8], strides = [1, 1]} : vector<32x128xf32> to vector<32x8xf32>
    %c0_22 = arith.constant 0 : index
    %c0_23 = arith.constant 0 : index
    %38 = vector.load %arg10[%c0_22, %c0_23] : memref<32x8xf32, #tpu.memory_space<vmem>>, vector<32x8xf32>
    tpu.vector_store %arg10[%c0_22, %c0_23], %37 {strides = array<i32>} : memref<32x8xf32, #tpu.memory_space<vmem>>, vector<32x8xf32>,
    return
  }
  func.func @transform_0(%arg0: i32) -> (i32, i32) {
    %c0_i32 = arith.constant 0 : i32
    %c0_i32_0 = arith.constant 0 : i32
    return %arg0, %c0_i32 : i32, i32
  }
  func.func @transform_1(%arg0: i32) -> (i32, i32) {
    %c0_i32 = arith.constant 0 : i32
    %c0_i32_0 = arith.constant 0 : i32
    %c0_i32_1 = arith.constant 0 : i32
    return %c0_i32, %c0_i32_0 : i32, i32
  }
  func.func @transform_2(%arg0: i32) -> (i32, i32) {
    %c0_i32 = arith.constant 0 : i32
    %c0_i32_0 = arith.constant 0 : i32
    %c0_i32_1 = arith.constant 0 : i32
    return %c0_i32, %c0_i32_0 : i32, i32
  }
  func.func @transform_3(%arg0: i32) -> (i32, i32) {
    %c0_i32 = arith.constant 0 : i32
    %c0_i32_0 = arith.constant 0 : i32
    %c0_i32_1 = arith.constant 0 : i32
    return %c0_i32, %c0_i32_0 : i32, i32
  }
  func.func @transform_4(%arg0: i32) -> (i32, i32) {
    %c0_i32 = arith.constant 0 : i32
    %c0_i32_0 = arith.constant 0 : i32
    %c0_i32_1 = arith.constant 0 : i32
    return %c0_i32, %c0_i32_0 : i32, i32
  }
  func.func @transform_5(%arg0: i32) -> (i32, i32) {
    %c0_i32 = arith.constant 0 : i32
    %c0_i32_0 = arith.constant 0 : i32
    %c0_i32_1 = arith.constant 0 : i32
    return %c0_i32, %c0_i32_0 : i32, i32
  }
  func.func @transform_6(%arg0: i32) -> (i32, i32) {
    %c0_i32 = arith.constant 0 : i32
    %c0_i32_0 = arith.constant 0 : i32
    %c0_i32_1 = arith.constant 0 : i32
    return %c0_i32, %c0_i32_0 : i32, i32
  }
  func.func @transform_7(%arg0: i32) -> (i32, i32) {
    %c0_i32 = arith.constant 0 : i32
    %c0_i32_0 = arith.constant 0 : i32
    %c0_i32_1 = arith.constant 0 : i32
    return %c0_i32, %c0_i32_0 : i32, i32
  }
  func.func @transform_8(%arg0: i32) -> (i32, i32) {
    %c0_i32 = arith.constant 0 : i32
    %c0_i32_0 = arith.constant 0 : i32
    %c0_i32_1 = arith.constant 0 : i32
    return %c0_i32, %c0_i32_0 : i32, i32
  }
  func.func @transform_9(%arg0: i32) -> (i32, i32) {
    %c0_i32 = arith.constant 0 : i32
    %c0_i32_0 = arith.constant 0 : i32
    return %arg0, %c0_i32 : i32, i32
  }
}

</mosaic_0001>

<bundles_post_ra>
// kernel: _actor_forward_impl.1
= control target key start
LH: loop header
LB: loop body
LE: loop exit
PB: predicated region body
PF: predicated region fallthrough
CT: control target
= control target key end

     0   :  { %14 = vsyncpa [#allocation3], 0  ;;  %s1669_s0 = inlined_call_operand.hbm [shape: f32[32,32], index: 0, kind: input, shape index: {}]   ;;  %s1670_s1 = inlined_call_operand.hbm [shape: bf16[32,128], index: 1, kind: input, shape index: {}]   ;;  %s1671_s2 = inlined_call_operand.vmem [shape: f32[1,128], index: 2, kind: input, shape index: {}]   ;;  %s1672_s3 = inlined_call_operand.hbm [shape: bf16[128,512], index: 3, kind: input, shape index: {}]   ;;  %s1673_s4 = inlined_call_operand.hbm [shape: f32[1,512], index: 4, kind: input, shape index: {}]   ;;  %s1674_s5 = inlined_call_operand.hbm [shape: bf16[512,128], index: 5, kind: input, shape index: {}]   ;;  %s1675_s6 = inlined_call_operand.vmem [shape: f32[1,128], index: 6, kind: input, shape index: {}]   ;;  %s1676_s7 = inlined_call_operand.hbm [shape: bf16[128,128], index: 7, kind: input, shape index: {}]   ;;  %s1677_s8 = inlined_call_operand.vmem [shape: f32[1,128], index: 8, kind: input, shape index: {}]   ;;  %s1678_s9 = inlined_call_operand.vmem [shape: f32[32,8], index: 9, kind: output, shape index: {}]  }
   0x1   :  { %15 = vsyncpa [#allocation5], 0 }
   0x2   :  { %16 = vsyncpa [#allocation8], 0 }
   0x3   :  { %17 = vsyncpa [#allocation11], 0  ;;  %s1556_s30 = smov [#allocation4]  }
   0x4   :  { %s35_s10 = sshll.u32 %s1556_s30, 4  ;;  %s36_s10 = int_to_ptr.vmem [resolvable:$true] %s35_s10 }
   0x5   :  { %s1436_s11 = scalar_lea.vmem %s36_s10, 256  ;;  %p1441_p1 = scmp.lt.s32.totalorder %s36_s10, %s36_s10 }
   0x6   :  { %p1437_p0 = scmp.ne.s32.totalorder %s36_s10, %s1436_s11  ;;  %p1442_p2 = scmp.lt.s32.totalorder %s1436_s11, %s1436_s11 }
   0x8   :  { %p1443_p3 = por %p1442_p2, %p1441_p1 }
   0xa   :  { %p1444_p4 = pnand %p1443_p3, %p1437_p0 }
   0xc   :  { %1447 = shalt.err (!%p1444_p4)
}
   0xd   :  { %s1557_s12 = smov 64   ;;  %s1558_s13 = smov 4  }
   0xe   :  { %41 = dma.hbm_to_vmem [thread:$0]  %s1670_s1, 256, %s36_s10, [#allocation5], %s1557_s12, %s1557_s12, %s1558_s13  }
   0xf   :  { %s1559_s16 = smov [#allocation7]   ;;  %s1560_s18 = smov [#allocation2]  }
  0x10   :  { %s62_s17 = sshll.u32 %s1559_s16, 4  ;;  %s23_s19 = sshll.u32 %s1560_s18, 4  ;;  %s63_s17 = int_to_ptr.vmem [resolvable:$true] %s62_s17  ;;  %s24_s19 = int_to_ptr.vmem [resolvable:$true] %s23_s19 }
  0x11   :  { %s1456_s20 = scalar_lea.vmem %s63_s17, 64  ;;  %p1461_p6 = scmp.lt.s32.totalorder %s63_s17, %s63_s17 }
  0x12   :  { %p1457_p5 = scmp.ne.s32.totalorder %s63_s17, %s1456_s20  ;;  %p1462_p7 = scmp.lt.s32.totalorder %s1456_s20, %s1456_s20 }
  0x14   :  { %p1463_p8 = por %p1462_p7, %p1461_p6 }
  0x16   :  { %p1464_p9 = pnand %p1463_p8, %p1457_p5 }
  0x18   :  { %1467 = shalt.err (!%p1464_p9)
}
  0x19   :  { %65 = dma.hbm_to_vmem [thread:$0]  %s1673_s4, 64, %s63_s17, [#allocation8]  }
  0x1a   :  { %s1476_s23 = scalar_lea.vmem %s24_s19, 512  ;;  %p1481_p11 = scmp.lt.s32.totalorder %s24_s19, %s24_s19 }
  0x1b   :  { %p1477_p10 = scmp.ne.s32.totalorder %s24_s19, %s1476_s23  ;;  %p1482_p12 = scmp.lt.s32.totalorder %s1476_s23, %s1476_s23 }
  0x1d   :  { %p1483_p13 = por %p1482_p12, %p1481_p11 }
  0x1f   :  { %p1484_p0 = pnand %p1483_p13, %p1477_p10 }
  0x21   :  { %1487 = shalt.err (!%p1484_p0)
}
  0x22   :  { %s1561_s1 = smov 128   ;;  %s1562_s24 = smov 8  }
  0x23   :  { %29 = dma.hbm_to_vmem [thread:$0]  %s1669_s0, 512, %s24_s19, [#allocation3], %s1561_s1, %s1561_s1, %s1562_s24  }
  0x24   :  { %s1563_s27 = smov [#allocation6]  }
  0x25   :  { %s49_s28 = sshll.u32 %s1563_s27, 4  ;;  %s50_s28 = int_to_ptr.vmem [resolvable:$true] %s49_s28 }
  0x26   :  { %s1496_s29 = scalar_lea.vmem %s50_s28, 4096  ;;  %p1501_p2 = scmp.lt.s32.totalorder %s50_s28, %s50_s28 }
  0x27   :  { %p1497_p1 = scmp.ne.s32.totalorder %s50_s28, %s1496_s29  ;;  %p1502_p3 = scmp.lt.s32.totalorder %s1496_s29, %s1496_s29 }
  0x29   :  { %p1503_p4 = por %p1502_p3, %p1501_p2 }
  0x2b   :  { %p1504_p5 = pnand %p1503_p4, %p1497_p1 }
  0x2d   :  { %1507 = shalt.err (!%p1504_p5)
}
  0x2e   :  { %s1564_s4 = smov 256   ;;  %s1565_s30 = smov 16  }
  0x2f   :  { %55 = dma.hbm_to_vmem [thread:$0]  %s1672_s3, 4096, %s50_s28, [#allocation5], %s1564_s4, %s1564_s4, %s1565_s30  }
  0x30   :  { %s1566_s14 = smov [#allocation9]   ;;  %s1567_s16 = smov [#allocation10]  }
  0x31   :  { %s71_s15 = sshll.u32 %s1566_s14, 4  ;;  %s85_s0 = sshll.u32 %s1567_s16, 4  ;;  %s72_s15 = int_to_ptr.vmem [resolvable:$true] %s71_s15  ;;  %s86_s0 = int_to_ptr.vmem [resolvable:$true] %s85_s0 }
  0x32   :  { %s1516_s17 = scalar_lea.vmem %s72_s15, 4096  ;;  %p1521_p7 = scmp.lt.s32.totalorder %s72_s15, %s72_s15 }
  0x33   :  { %p1517_p6 = scmp.ne.s32.totalorder %s72_s15, %s1516_s17  ;;  %p1522_p8 = scmp.lt.s32.totalorder %s1516_s17, %s1516_s17 }
  0x35   :  { %p1523_p9 = por %p1522_p8, %p1521_p7 }
  0x37   :  { %p1524_p10 = pnand %p1523_p9, %p1517_p6 }
  0x39   :  { %1527 = shalt.err (!%p1524_p10)
}
  0x3a   :  { %77 = dma.hbm_to_vmem [thread:$0]  %s1674_s5, 4096, %s72_s15, [#allocation8], %s1557_s12, %s1557_s12, %s1558_s13  }
  0x3b   :  { %s1536_s3 = scalar_lea.vmem %s86_s0, 1024  ;;  %p1541_p12 = scmp.lt.s32.totalorder %s86_s0, %s86_s0 }
  0x3c   :  { %p1537_p11 = scmp.ne.s32.totalorder %s86_s0, %s1536_s3  ;;  %p1542_p13 = scmp.lt.s32.totalorder %s1536_s3, %s1536_s3 }
  0x3e   :  { %p1543_p0 = por %p1542_p13, %p1541_p12 }
  0x40   :  { %p1544_p1 = pnand %p1543_p0, %p1537_p11 }
  0x42   :  { %1547 = shalt.err (!%p1544_p1)
}
  0x43   :  { %91 = dma.hbm_to_vmem [thread:$0]  %s1676_s7, 1024, %s86_s0, [#allocation11], %s1557_s12, %s1557_s12, %s1558_s13  }
  0x44   :  { %1548 = dma.done.wait [#allocation3], 512  }
  0x45   :  { %1549 = vsyncadd [#allocation3], 4294966784 }
  0x46   :  { %1550 = dma.done.wait [#allocation5], 4352  }
  0x47   :  { %1551 = vsyncadd [#allocation5], 4294962944 }
  0x48   :  { %1552 = dma.done.wait [#allocation8], 4160  }
  0x49   :  { %1553 = vsyncadd [#allocation8], 4294963136 }
  0x4a   :  { %1554 = dma.done.wait [#allocation11], 1024  }
  0x4b   :  { %1555 = vsyncadd [#allocation11], 4294966272  ;;  %v1274_v0 = vld [vmem:[#allocation4 + $0x8] sm:$0xff]   ;;  %v1275_v1 = vld [vmem:[#allocation4] sm:$0xff]   ;;  %vm142_vm0 = vcmask 261120   ;;  %v1568_v38 = vmov 0  }
  0x4c   :  { %1233 = vmatprep.subr.bf16.mxu0 %v1274_v0  ;;  %v113_v2 = vld [vmem:[#allocation2] sm:$0xff]  ;;  %v114_v3 = vld [vmem:[#allocation2 + $0x8] sm:$0xff]  ;;  %v115_v4 = vld [vmem:[#allocation2 + $0x10] sm:$0xff]  ;;  %450 = vmatprep.mubr.bf16.mxu1 %v1568_v38  ;;  %vm1071_vm1 = vcmask 64512  }
  0x4d   :  { %1234 = vmatpush3.bf16.msra.mxu0 %v1274_v0  ;;  %v117_v5 = vpack.c.bf16 %v114_v3, %v113_v2  ;;  %v116_v6 = vld [vmem:[#allocation2 + $0x18] sm:$0xff]  ;;  %v1276_v7 = vld [vmem:[#allocation6 + $0xe4] ss:$16 sps:$4 sm:$0xff]   ;;  %v1281_v9 = vld [vmem:[#allocation6 + $0xe0] ss:$16 sps:$4 sm:$0xff]  }
  0x4e   :  { %1235 = vmatprep.subr.bf16.mxu0 %v1275_v1  ;;  %v1280_v8 = vld [vmem:[#allocation6 + $0xec] ss:$16 sps:$4 sm:$0xff]   ;;  %v118_v10 = vpack.c.bf16 %v116_v6, %v115_v4  ;;  %418 = vmatprep.subr.bf16.mxu1 %v1276_v7  ;;  %v1282_v11 = vld [vmem:[#allocation6 + $0xc4] ss:$16 sps:$4 sm:$0xff]   ;;  %v1278_v12 = vld [vmem:[#allocation6 + $0xe8] ss:$16 sps:$4 sm:$0xff]  }
  0x4f   :  { %1237 = vmatprep.mubr.msk.bf16.mxu0 %vm142_vm0, %v117_v5  ;;  %419 = vmatpush1.bf16.msra.mxu1 %v1281_v9  ;;  %v1286_v13 = vld [vmem:[#allocation6 + $0xcc] ss:$16 sps:$4 sm:$0xff]   ;;  %v1287_v14 = vld [vmem:[#allocation6 + $0xc0] ss:$16 sps:$4 sm:$0xff]   ;;  %v1284_v15 = vld [vmem:[#allocation6 + $0xc8] ss:$16 sps:$4 sm:$0xff]  }
  0x50   :  { %420 = vmatprep.subr.bf16.mxu1 %v1282_v11  ;;  %v1288_v16 = vld [vmem:[#allocation6 + $0xa4] ss:$16 sps:$4 sm:$0xff]   ;;  %v1292_v17 = vld [vmem:[#allocation6 + $0xac] ss:$16 sps:$4 sm:$0xff]   ;;  %v1290_v18 = vld [vmem:[#allocation6 + $0xa8] ss:$16 sps:$4 sm:$0xff]  }
  0x51   :  { %1236 = vmatpush3.bf16.msra.mxu0 %v1275_v1  ;;  %v1293_v19 = vld [vmem:[#allocation6 + $0xa0] ss:$16 sps:$4 sm:$0xff]   ;;  %v1294_v20 = vld [vmem:[#allocation6 + $0x84] ss:$16 sps:$4 sm:$0xff]   ;;  %v1298_v21 = vld [vmem:[#allocation6 + $0x8c] ss:$16 sps:$4 sm:$0xff]  }
  0x52   :  { %471 = vmatprep.subr.bf16.mxu0 %v1280_v8  ;;  %v1296_v22 = vld [vmem:[#allocation6 + $0x88] ss:$16 sps:$4 sm:$0xff]   ;;  %v1299_v23 = vld [vmem:[#allocation6 + $0x80] ss:$16 sps:$4 sm:$0xff]   ;;  %v1300_v24 = vld [vmem:[#allocation6 + $0x64] ss:$16 sps:$4 sm:$0xff]  }
  0x53   :  { %421 = vmatpush1.bf16.msra.mxu1 %v1287_v14  ;;  %v1304_v25 = vld [vmem:[#allocation6 + $0x6c] ss:$16 sps:$4 sm:$0xff]   ;;  %v1302_v26 = vld [vmem:[#allocation6 + $0x68] ss:$16 sps:$4 sm:$0xff]   ;;  %v1305_v27 = vld [vmem:[#allocation6 + $0x60] ss:$16 sps:$4 sm:$0xff]  }
  0x54   :  { %1238 = vmatmul.mubr.msk.bf16.vlgmr.msra.gmra.mxu0 %vm142_vm0, %v118_v10  ;;  %422 = vmatprep.subr.bf16.mxu1 %v1288_v16  ;;  %v1306_v28 = vld [vmem:[#allocation6 + $0x44] ss:$16 sps:$4 sm:$0xff]   ;;  %v1310_v29 = vld [vmem:[#allocation6 + $0x4c] ss:$16 sps:$4 sm:$0xff]   ;;  %v1308_v30 = vld [vmem:[#allocation6 + $0x48] ss:$16 sps:$4 sm:$0xff]  }
  0x55   :  { %472 = vmatpush1.bf16.msra.mxu0 %v1278_v12  ;;  %v1311_v31 = vld [vmem:[#allocation6 + $0x40] ss:$16 sps:$4 sm:$0xff]   ;;  %v1312_v32 = vld [vmem:[#allocation6 + $0x24] ss:$16 sps:$4 sm:$0xff]   ;;  %v1316_v33 = vld [vmem:[#allocation6 + $0x2c] ss:$16 sps:$4 sm:$0xff]   ;;  %503 = vmatprep.mubr.bf16.mxu0 %v1568_v38 }
  0x56   :  { %473 = vmatprep.subr.bf16.mxu0 %v1286_v13  ;;  %v1314_v34 = vld [vmem:[#allocation6 + $0x28] ss:$16 sps:$4 sm:$0xff]   ;;  %v1317_v35 = vld [vmem:[#allocation6 + $0x20] ss:$16 sps:$4 sm:$0xff]   ;;  %v1318_v36 = vld [vmem:[#allocation6 + $0x4] ss:$16 sps:$4 sm:$0xff]  }
  0x57   :  { %423 = vmatpush1.bf16.msra.mxu1 %v1293_v19  ;;  %v1322_v37 = vld [vmem:[#allocation6 + $0xc] ss:$16 sps:$4 sm:$0xff]   ;;  %v1320_v39 = vld [vmem:[#allocation6 + $0x8] ss:$16 sps:$4 sm:$0xff]   ;;  %v1323_v40 = vld [vmem:[#allocation6] ss:$16 sps:$4 sm:$0xff]  }
  0x58   :  { %424 = vmatprep.subr.bf16.mxu1 %v1294_v20  ;;  %v1324_v41 = vld [vmem:[#allocation9 + $0x78] sm:$0xff]   ;;  %v1084_v45 = vld [vmem:[%s1671_s2] ss:$0 sm:$0xff]  ;;  %v1328_v57 = vld [vmem:[#allocation9 + $0x70] sm:$0xff]  }
  0x59   :  { %474 = vmatpush1.bf16.msra.mxu0 %v1284_v15  ;;  %v1325_v42 = vld [vmem:[#allocation9 + $0xf8] sm:$0xff]   ;;  %v1329_v58 = vld [vmem:[#allocation9 + $0xf0] sm:$0xff]   ;;  %v1332_v0 = vld [vmem:[#allocation9 + $0x68] sm:$0xff]  }
  0x5a   :  { %475 = vmatprep.subr.bf16.mxu0 %v1292_v17  ;;  %v1326_v55 = vld [vmem:[#allocation9 + $0x38] sm:$0xff]   ;;  %v1330_v59 = vld [vmem:[#allocation9 + $0x30] sm:$0xff]   ;;  %v1333_v1 = vld [vmem:[#allocation9 + $0xe8] sm:$0xff]  }
  0x5b   :  { %425 = vmatpush1.bf16.msra.mxu1 %v1299_v23  ;;  %v1327_v56 = vld [vmem:[#allocation9 + $0xb8] sm:$0xff]   ;;  %v1331_v60 = vld [vmem:[#allocation9 + $0xb0] sm:$0xff]   ;;  %v1334_v2 = vld [vmem:[#allocation9 + $0x28] sm:$0xff]  }
  0x5c   :  { %426 = vmatprep.subr.bf16.mxu1 %v1300_v24  ;;  %v1335_v3 = vld [vmem:[#allocation9 + $0xa8] sm:$0xff]   ;;  %v1336_v4 = vld [vmem:[#allocation9 + $0x60] sm:$0xff]   ;;  %v1340_v8 = vld [vmem:[#allocation9 + $0x58] sm:$0xff]   ;;  %v238_v24 = vlaneseq }
  0x5d   :  { %476 = vmatpush1.bf16.msra.mxu0 %v1290_v18  ;;  %v1337_v5 = vld [vmem:[#allocation9 + $0xe0] sm:$0xff]   ;;  %v1341_v9 = vld [vmem:[#allocation9 + $0xd8] sm:$0xff]   ;;  %v1344_v12 = vld [vmem:[#allocation9 + $0x50] sm:$0xff]  }
  0x5e   :  { %477 = vmatprep.subr.bf16.mxu0 %v1298_v21  ;;  %v1338_v6 = vld [vmem:[#allocation9 + $0x20] sm:$0xff]   ;;  %v1342_v10 = vld [vmem:[#allocation9 + $0x18] sm:$0xff]   ;;  %v1345_v13 = vld [vmem:[#allocation9 + $0xd0] sm:$0xff]  }
  0x5f   :  { %427 = vmatpush1.bf16.msra.mxu1 %v1305_v27  ;;  %v1339_v7 = vld [vmem:[#allocation9 + $0xa0] sm:$0xff]   ;;  %v1343_v11 = vld [vmem:[#allocation9 + $0x98] sm:$0xff]   ;;  %v1346_v14 = vld [vmem:[#allocation9 + $0x10] sm:$0xff]  }
  0x60   :  { %428 = vmatprep.subr.bf16.mxu1 %v1306_v28  ;;  %v1347_v15 = vld [vmem:[#allocation9 + $0x90] sm:$0xff]   ;;  %v1348_v16 = vld [vmem:[#allocation9 + $0x48] sm:$0xff]   ;;  %v1352_v20 = vld [vmem:[#allocation9 + $0x40] sm:$0xff]  }
  0x61   :  { %478 = vmatpush1.bf16.msra.mxu0 %v1296_v22  ;;  %v1349_v17 = vld [vmem:[#allocation9 + $0xc8] sm:$0xff]   ;;  %v1353_v21 = vld [vmem:[#allocation9 + $0xc0] sm:$0xff]   ;;  %v236_v27 = vld [vmem:[#allocation7] sm:$0xf] }
  0x62   :  { %479 = vmatprep.subr.bf16.mxu0 %v1304_v25  ;;  %v1350_v18 = vld [vmem:[#allocation9 + $0x8] sm:$0xff]   ;;  %v1354_v22 = vld [vmem:[#allocation9] sm:$0xff]   ;;  %v239_v25 = vshrl.u32 %v238_v24, 7 }
  0x63   :  { %429 = vmatpush1.bf16.msra.mxu1 %v1311_v31  ;;  %v1351_v19 = vld [vmem:[#allocation9 + $0x88] sm:$0xff]   ;;  %v1355_v23 = vld [vmem:[#allocation9 + $0x80] sm:$0xff]  }
  0x64   :  { %430 = vmatprep.subr.bf16.mxu1 %v1312_v32  ;;  %v244_v28 = vsub.s32 1, %v239_v25  ;;  %v248_v31 = vsub.s32 2, %v239_v25 }
  0x65   :  { %480 = vmatpush1.bf16.msra.mxu0 %v1302_v26  ;;  %v240_v26 = vsub.s32 0, %v239_v25 }
  0x66   :  { %481 = vmatprep.subr.bf16.mxu0 %v1310_v29  ;;  %v252_v29 = vsub.s32 3, %v239_v25  ;;  %v245_v32 = vrot.slane %v236_v27, %v244_v28  ;;  %v1357_v28 = vld [vmem:[#allocation10 + $0x30] sm:$0xff]  }
  0x67   :  { %431 = vmatpush1.bf16.msra.mxu1 %v1317_v35 }
  0x68   :  { %432 = vmatprep.subr.bf16.mxu1 %v1318_v36 }
  0x69   :  { %482 = vmatpush1.bf16.msra.mxu0 %v1308_v30  ;;  %v241_v30 = vrot.slane %v236_v27, %v240_v26 }
  0x6a   :  { %483 = vmatprep.subr.bf16.mxu0 %v1316_v33  ;;  %v253_v33 = vrot.slane %v236_v27, %v252_v29  ;;  %v1358_v29 = vld [vmem:[#allocation10 + $0x28] sm:$0xff]  }
  0x6b   :  { %433 = vmatpush1.bf16.msra.mxu1 %v1323_v40 }
  0x6c   :  { %1167 = vmatprep.subr.bf16.mxu1 %v1324_v41 }
  0x6d   :  { %484 = vmatpush1.bf16.msra.mxu0 %v1314_v34 }
  0x6e   :  { %485 = vmatprep.subr.bf16.mxu0 %v1322_v37 }
  0x71   :  { %486 = vmatpush1.bf16.msra.mxu0 %v1320_v39  ;;  %v249_v39 = vrot.slane %v236_v27, %v248_v31  ;;  %v1356_v27 = vld [vmem:[#allocation10 + $0x38] sm:$0xff]  }
  0x72   :  { %1195 = vmatprep.subr.bf16.mxu0 %v1325_v42  ;;  %v1360_v31 = vld [vmem:[#allocation10 + $0x18] sm:$0xff]  }
 0x114   :  { %v1239_v43 = vpop.f32.mrf.mxu0 }
 0x115   :  { %v192_v51 = vadd.f32 %v1239_v43, %v1084_v45 }
 0x116   :  { %v183_v44 = vpop.f32.mrf.mxu0 }
 0x117   :  { %v184_v46 = vadd.f32 %v1084_v45, %v183_v44 }
 0x118   :  { %v1240_v47 = vpop.f32.mrf.mxu0 }
 0x119   :  { %1364 = vtanh.f32 %v184_v46  ;;  %v195_v50 = vadd.f32 %v1240_v47, %v1084_v45 }
 0x11a   :  { %v186_v48 = vpop.f32.mrf.mxu0 }
 0x11b   :  { %v187_v49 = vadd.f32 %v1084_v45, %v186_v48 }
 0x11d   :  { %1366 = vtanh.f32 %v187_v49 }
 0x11e   :  { %1368 = vtanh.f32 %v195_v50 }
 0x11f   :  { %1370 = vtanh.f32 %v192_v51 }
 0x126   :  { %v1365_v52 = vpop.eup %1364 }
 0x12a   :  { %v1367_v53 = vpop.eup %1366 }
 0x12b   :  { %v202_v54 = vpack.c.bf16 %v1367_v53, %v1365_v52  ;;  %v1369_v61 = vpop.eup %1368 }
 0x12c   :  { %v1371_v62 = vpop.eup %1370 }
 0x12d   :  { %451 = vmatmul.mubr.bf16.vlgmr.msra.gmra.mxu1 %v202_v54  ;;  %504 = vmatmul.mubr.bf16.vlgmr.msra.gmra.mxu0 %v202_v54  ;;  %v203_v63 = vpack.c.bf16 %v1369_v61, %v1371_v62 }
 0x12e   :  { %460 = vmatprep.mubr.bf16.mxu1 %v1568_v38  ;;  %513 = vmatprep.mubr.bf16.mxu0 %v1568_v38 }
 0x12f   :  { %1168 = vmatpush3.bf16.msra.mxu1 %v1326_v55  ;;  %1196 = vmatpush3.bf16.msra.mxu0 %v1327_v56 }
 0x130   :  { %1169 = vmatprep.subr.bf16.mxu1 %v1328_v57  ;;  %1197 = vmatprep.subr.bf16.mxu0 %v1329_v58 }
 0x133   :  { %1170 = vmatpush3.bf16.msra.mxu1 %v1330_v59  ;;  %1198 = vmatpush3.bf16.msra.mxu0 %v1331_v60 }
 0x134   :  { %1171 = vmatprep.subr.bf16.mxu1 %v1332_v0  ;;  %1199 = vmatprep.subr.bf16.mxu0 %v1333_v1 }
 0x135   :  { %461 = vmatmul.mubr.bf16.gmra.mxu1 %v203_v63  ;;  %514 = vmatmul.mubr.bf16.gmra.mxu0 %v203_v63 }
 0x137   :  { %1172 = vmatpush3.bf16.msra.mxu1 %v1334_v2  ;;  %1200 = vmatpush3.bf16.msra.mxu0 %v1335_v3 }
 0x138   :  { %1173 = vmatprep.subr.bf16.mxu1 %v1336_v4  ;;  %1201 = vmatprep.subr.bf16.mxu0 %v1337_v5 }
 0x13b   :  { %1174 = vmatpush3.bf16.msra.mxu1 %v1338_v6  ;;  %1202 = vmatpush3.bf16.msra.mxu0 %v1339_v7 }
 0x13c   :  { %1175 = vmatprep.subr.bf16.mxu1 %v1340_v8  ;;  %1203 = vmatprep.subr.bf16.mxu0 %v1341_v9 }
 0x13f   :  { %1176 = vmatpush3.bf16.msra.mxu1 %v1342_v10  ;;  %1204 = vmatpush3.bf16.msra.mxu0 %v1343_v11 }
 0x140   :  { %1177 = vmatprep.subr.bf16.mxu1 %v1344_v12  ;;  %1205 = vmatprep.subr.bf16.mxu0 %v1345_v13 }
 0x143   :  { %1178 = vmatpush3.bf16.msra.mxu1 %v1346_v14  ;;  %1206 = vmatpush3.bf16.msra.mxu0 %v1347_v15 }
 0x144   :  { %1179 = vmatprep.subr.bf16.mxu1 %v1348_v16  ;;  %1207 = vmatprep.subr.bf16.mxu0 %v1349_v17 }
 0x147   :  { %1180 = vmatpush3.bf16.msra.mxu1 %v1350_v18  ;;  %1208 = vmatpush3.bf16.msra.mxu0 %v1351_v19 }
 0x148   :  { %1181 = vmatprep.subr.bf16.mxu1 %v1352_v20  ;;  %1209 = vmatprep.subr.bf16.mxu0 %v1353_v21 }
 0x14b   :  { %1182 = vmatpush3.bf16.msra.mxu1 %v1354_v22  ;;  %1210 = vmatpush3.bf16.msra.mxu0 %v1355_v23 }
 0x14c   :  { %1241 = vmatprep.subr.bf16.mxu1 %v1356_v27 }
 0x1ed   :  { %v452_v34 = vpop.f32.mrf.mxu1  ;;  %v505_v35 = vpop.f32.mrf.mxu0 }
 0x1ee   :  { %v453_v36 = vadd.f32 %v452_v34, %v241_v30  ;;  %v506_v48 = vadd.f32 %v505_v35, %v249_v39  ;;  %v1363_v34 = vld [vmem:[#allocation10] sm:$0xff]  }
 0x1ef   :  { %v454_v37 = vpop.f32.mrf.mxu1  ;;  %v507_v38 = vpop.f32.mrf.mxu0 }
 0x1f0   :  { %v455_v40 = vadd.f32 %v454_v37, %v245_v32  ;;  %v508_v41 = vadd.f32 %v507_v38, %v253_v33  ;;  %1372 = vtanh.f32 %v453_v36  ;;  %v1121_v37 = vld [vmem:[%s1675_s6] ss:$0 sm:$0xff] }
 0x1f1   :  { %v456_v42 = vpop.f32.mrf.mxu1  ;;  %v509_v43 = vpop.f32.mrf.mxu0 }
 0x1f2   :  { %1374 = vtanh.f32 %v455_v40  ;;  %v457_v44 = vadd.f32 %v456_v42, %v241_v30  ;;  %v510_v45 = vadd.f32 %v509_v43, %v249_v39 }
 0x1f3   :  { %1376 = vtanh.f32 %v508_v41  ;;  %v458_v46 = vpop.f32.mrf.mxu1  ;;  %v511_v47 = vpop.f32.mrf.mxu0 }
 0x1f4   :  { %1378 = vtanh.f32 %v457_v44  ;;  %v459_v49 = vadd.f32 %v458_v46, %v245_v32  ;;  %v512_v50 = vadd.f32 %v511_v47, %v253_v33 }
 0x1f5   :  { %1380 = vtanh.f32 %v510_v45  ;;  %v462_v51 = vpop.f32.mrf.mxu1  ;;  %v515_v52 = vpop.f32.mrf.mxu0 }
 0x1f6   :  { %1382 = vtanh.f32 %v459_v49  ;;  %v463_v53 = vadd.f32 %v462_v51, %v241_v30  ;;  %v516_v0 = vadd.f32 %v515_v52, %v249_v39 }
 0x1f7   :  { %1384 = vtanh.f32 %v512_v50  ;;  %v464_v54 = vpop.f32.mrf.mxu1  ;;  %v517_v55 = vpop.f32.mrf.mxu0 }
 0x1f8   :  { %1386 = vtanh.f32 %v506_v48  ;;  %v465_v56 = vadd.f32 %v464_v54, %v245_v32  ;;  %v518_v57 = vadd.f32 %v517_v55, %v253_v33 }
 0x1f9   :  { %1388 = vtanh.f32 %v463_v53  ;;  %v466_v58 = vpop.f32.mrf.mxu1  ;;  %v519_v59 = vpop.f32.mrf.mxu0 }
 0x1fa   :  { %1390 = vtanh.f32 %v465_v56  ;;  %v467_v60 = vadd.f32 %v466_v58, %v241_v30  ;;  %v520_v61 = vadd.f32 %v519_v59, %v249_v39  ;;  %v1359_v30 = vld [vmem:[#allocation10 + $0x20] sm:$0xff]  }
 0x1fb   :  { %1392 = vtanh.f32 %v518_v57  ;;  %v468_v62 = vpop.f32.mrf.mxu1  ;;  %v521_v63 = vpop.f32.mrf.mxu0 }
 0x1fc   :  { %1394 = vtanh.f32 %v467_v60  ;;  %v469_v1 = vadd.f32 %v468_v62, %v245_v32  ;;  %v522_v2 = vadd.f32 %v521_v63, %v253_v33  ;;  %v1361_v32 = vld [vmem:[#allocation10 + $0x10] sm:$0xff]   ;;  %v1362_v33 = vld [vmem:[#allocation10 + $0x8] sm:$0xff]  }
 0x1fd   :  { %1396 = vtanh.f32 %v520_v61  ;;  %v1373_v3 = vpop.eup %1372 }
 0x1fe   :  { %1398 = vtanh.f32 %v469_v1 }
 0x1ff   :  { %v1375_v4 = vpop.eup %1374  ;;  %1400 = vtanh.f32 %v522_v2 }
 0x200   :  { %v1377_v5 = vpop.eup %1376  ;;  %1402 = vtanh.f32 %v516_v0 }
 0x201   :  { %v1379_v6 = vpop.eup %1378 }
 0x202   :  { %v1381_v7 = vpop.eup %1380  ;;  %v540_v13 = vpack.c.bf16 %v1379_v6, %v1373_v3 }
 0x203   :  { %v1383_v8 = vpop.eup %1382 }
 0x204   :  { %v1385_v9 = vpop.eup %1384  ;;  %v541_v10 = vpack.c.bf16 %v1383_v8, %v1375_v4 }
 0x205   :  { %v1387_v11 = vpop.eup %1386  ;;  %v543_v12 = vpack.c.bf16 %v1385_v9, %v1377_v5 }
 0x206   :  { %v1389_v14 = vpop.eup %1388  ;;  %843 = vmatprep.mubr.bf16.mxu1 %v541_v10  ;;  %v542_v15 = vpack.c.bf16 %v1381_v7, %v1387_v11  ;;  %v1154_v10 = vld [vmem:[%s1677_s8] ss:$0 sm:$0xff] }
 0x207   :  { %v1391_v16 = vpop.eup %1390  ;;  %892 = vmatprep.mubr.bf16.mxu0 %v543_v12  ;;  %844 = vmatmul.mubr.bf16.vlgmr.msra.gmra.mxu1 %v540_v13 }
 0x208   :  { %v1393_v17 = vpop.eup %1392  ;;  %893 = vmatmul.mubr.bf16.vlgmr.msra.gmra.mxu0 %v542_v15  ;;  %1242 = vmatpush3.bf16.msra.mxu1 %v1356_v27 }
 0x209   :  { %v1395_v18 = vpop.eup %1394  ;;  %1243 = vmatprep.subr.bf16.mxu1 %v1357_v28 }
 0x20a   :  { %v1397_v19 = vpop.eup %1396  ;;  %v544_v25 = vpack.c.bf16 %v1395_v18, %v1389_v14 }
 0x20b   :  { %v1399_v20 = vpop.eup %1398 }
 0x20c   :  { %v1401_v21 = vpop.eup %1400  ;;  %v545_v22 = vpack.c.bf16 %v1399_v20, %v1391_v16  ;;  %1244 = vmatpush3.bf16.msra.mxu1 %v1357_v28 }
 0x20d   :  { %v1403_v23 = vpop.eup %1402  ;;  %v547_v24 = vpack.c.bf16 %v1401_v21, %v1393_v17  ;;  %1245 = vmatprep.subr.bf16.mxu1 %v1358_v29 }
 0x20e   :  { %851 = vmatprep.mubr.bf16.mxu1 %v545_v22  ;;  %v546_v26 = vpack.c.bf16 %v1397_v19, %v1403_v23 }
 0x20f   :  { %900 = vmatprep.mubr.bf16.mxu0 %v547_v24  ;;  %852 = vmatmul.mubr.bf16.gmra.mxu1 %v544_v25 }
 0x210   :  { %901 = vmatmul.mubr.bf16.gmra.mxu0 %v546_v26  ;;  %1246 = vmatpush3.bf16.msra.mxu1 %v1358_v29 }
 0x211   :  { %1247 = vmatprep.subr.bf16.mxu1 %v1359_v30 }
 0x214   :  { %1248 = vmatpush3.bf16.msra.mxu1 %v1359_v30 }
 0x215   :  { %1249 = vmatprep.subr.bf16.mxu1 %v1360_v31 }
 0x218   :  { %1250 = vmatpush3.bf16.msra.mxu1 %v1360_v31 }
 0x219   :  { %1251 = vmatprep.subr.bf16.mxu1 %v1361_v32 }
 0x21c   :  { %1252 = vmatpush3.bf16.msra.mxu1 %v1361_v32 }
 0x21d   :  { %1253 = vmatprep.subr.bf16.mxu1 %v1362_v33 }
 0x220   :  { %1254 = vmatpush3.bf16.msra.mxu1 %v1362_v33 }
 0x221   :  { %1255 = vmatprep.subr.bf16.mxu1 %v1363_v34 }
 0x224   :  { %1256 = vmatpush3.bf16.msra.mxu1 %v1363_v34 }
 0x2c7   :  { %v1183_v35 = vpop.f32.mrf.mxu1 }
 0x2c8   :  { %v1211_v36 = vpop.f32.mrf.mxu0 }
 0x2c9   :  { %v1184_v38 = vpop.f32.mrf.mxu1 }
 0x2ca   :  { %v1185_v39 = vadd.f32 %v1184_v38, %v1183_v35  ;;  %v1212_v40 = vpop.f32.mrf.mxu0 }
 0x2cb   :  { %v1186_v41 = vpop.f32.mrf.mxu1  ;;  %v1213_v44 = vadd.f32 %v1212_v40, %v1211_v36 }
 0x2cc   :  { %v846_v42 = vadd.f32 %v1185_v39, %v1121_v37  ;;  %v1214_v43 = vpop.f32.mrf.mxu0 }
 0x2cd   :  { %v1187_v45 = vpop.f32.mrf.mxu1 }
 0x2ce   :  { %v1188_v46 = vadd.f32 %v1187_v45, %v1186_v41  ;;  %v1215_v47 = vpop.f32.mrf.mxu0  ;;  %v895_v48 = vadd.f32 %v1213_v44, %v846_v42 }
 0x2cf   :  { %v1189_v49 = vpop.f32.mrf.mxu1  ;;  %v1216_v51 = vadd.f32 %v1215_v47, %v1214_v43 }
 0x2d0   :  { %v849_v50 = vadd.f32 %v1188_v46, %v1121_v37  ;;  %v1217_v52 = vpop.f32.mrf.mxu0  ;;  %1404 = vtanh.f32 %v895_v48 }
 0x2d1   :  { %v1190_v53 = vpop.f32.mrf.mxu1 }
 0x2d2   :  { %v898_v54 = vadd.f32 %v1216_v51, %v849_v50  ;;  %v1191_v55 = vadd.f32 %v1190_v53, %v1189_v49  ;;  %v1218_v56 = vpop.f32.mrf.mxu0 }
 0x2d3   :  { %v1192_v57 = vpop.f32.mrf.mxu1  ;;  %v1219_v60 = vadd.f32 %v1218_v56, %v1217_v52 }
 0x2d4   :  { %1406 = vtanh.f32 %v898_v54  ;;  %v854_v58 = vadd.f32 %v1191_v55, %v1121_v37  ;;  %v1220_v59 = vpop.f32.mrf.mxu0 }
 0x2d5   :  { %v1193_v61 = vpop.f32.mrf.mxu1 }
 0x2d6   :  { %v1194_v62 = vadd.f32 %v1193_v61, %v1192_v57  ;;  %v1221_v63 = vpop.f32.mrf.mxu0  ;;  %v903_v0 = vadd.f32 %v1219_v60, %v854_v58 }
 0x2d7   :  { %v1222_v2 = vadd.f32 %v1221_v63, %v1220_v59 }
 0x2d8   :  { %v857_v1 = vadd.f32 %v1194_v62, %v1121_v37  ;;  %1408 = vtanh.f32 %v903_v0 }
 0x2da   :  { %v906_v3 = vadd.f32 %v1222_v2, %v857_v1 }
 0x2dc   :  { %1410 = vtanh.f32 %v906_v3 }
 0x2dd   :  { %v1405_v4 = vpop.eup %1404 }
 0x2e1   :  { %v1407_v5 = vpop.eup %1406 }
 0x2e2   :  { %v913_v6 = vpack.c.bf16 %v1407_v5, %v1405_v4 }
 0x2e4   :  { %1257 = vmatprep.mubr.bf16.mxu1 %v913_v6 }
 0x2e5   :  { %v1409_v7 = vpop.eup %1408 }
 0x2e9   :  { %v1411_v8 = vpop.eup %1410 }
 0x2ea   :  { %v914_v9 = vpack.c.bf16 %v1411_v8, %v1409_v7 }
 0x2ec   :  { %1258 = vmatmul.mubr.bf16.vlgmr.msra.gmra.mxu1 %v914_v9 }
 0x3ac   :  { %v1259_v11 = vpop.f32.mrf.mxu1 }
 0x3ad   :  { %v1029_v12 = vadd.f32 %v1259_v11, %v1154_v10 }
 0x3ae   :  { %v1020_v13 = vpop.f32.mrf.mxu1 }
 0x3af   :  { %v1021_v14 = vadd.f32 %v1154_v10, %v1020_v13  ;;  %1039 = vmax.xlane.f32.xlu1 %v1029_v12 }
 0x3b0   :  { %v1260_v15 = vpop.f32.mrf.mxu1 }
 0x3b1   :  { %v1032_v16 = vadd.f32 %v1260_v15, %v1154_v10  ;;  %1035 = vmax.xlane.f32.xlu0 %v1021_v14 }
 0x3b2   :  { %v1023_v17 = vpop.f32.mrf.mxu1 }
 0x3b3   :  { %v1024_v18 = vadd.f32 %v1154_v10, %v1023_v17  ;;  %1041 = vmax.xlane.f32.xlu1 %v1032_v16 }
 0x3b5   :  { %1037 = vmax.xlane.f32.xlu0 %v1024_v18 }
 0x438   :  { %v1040_v19 = vpop.xlane.xlu1 %1039 }
 0x439   :  { %v1045_v20 = vsub.f32 %v1029_v12, %v1040_v19 }
 0x43a   :  { %v1036_v21 = vpop.xlane.xlu0 %1035 }
 0x43b   :  { %v1043_v22 = vsub.f32 %v1021_v14, %v1036_v21  ;;  %v1051_v25 = vmul.f32 1.442695, %v1045_v20 }
 0x43c   :  { %v1042_v23 = vpop.xlane.xlu1 %1041 }
 0x43d   :  { %v1047_v24 = vmul.f32 1.442695, %v1043_v22  ;;  %v1046_v27 = vsub.f32 %v1032_v16, %v1042_v23 }
 0x43e   :  { %v1038_v26 = vpop.xlane.xlu0 %1037 }
 0x43f   :  { %1412 = vpow2.f32 %v1047_v24  ;;  %v1044_v28 = vsub.f32 %v1024_v18, %v1038_v26  ;;  %v1053_v30 = vmul.f32 1.442695, %v1046_v27 }
 0x440   :  { %1414 = vpow2.f32 %v1051_v25 }
 0x441   :  { %v1049_v29 = vmul.f32 1.442695, %v1044_v28 }
 0x443   :  { %1416 = vpow2.f32 %v1049_v29 }
 0x444   :  { %1418 = vpow2.f32 %v1053_v30 }
 0x44c   :  { %v1413_v31 = vpop.eup %1412 }
 0x44d   :  { %1055 = vadd.xlane.f32.xlu0 %v1413_v31  ;;  %v1415_v32 = vpop.eup %1414 }
 0x450   :  { %v1417_v33 = vpop.eup %1416 }
 0x451   :  { %1059 = vadd.xlane.f32.xlu0 %v1415_v32  ;;  %1057 = vadd.xlane.f32.xlu1 %v1417_v33  ;;  %v1419_v34 = vpop.eup %1418 }
 0x455   :  { %1061 = vadd.xlane.f32.xlu1 %v1419_v34 }
 0x4d6   :  { %v1056_v35 = vpop.xlane.xlu0 %1055 }
 0x4d7   :  { %1420 = vrcp.f32 %v1056_v35 }
 0x4da   :  { %v1058_v36 = vpop.xlane.xlu1 %1057  ;;  %v1060_v37 = vpop.xlane.xlu0 %1059 }
 0x4db   :  { %1422 = vrcp.f32 %v1058_v36 }
 0x4dc   :  { %1424 = vrcp.f32 %v1060_v37 }
 0x4de   :  { %v1062_v38 = vpop.xlane.xlu1 %1061 }
 0x4df   :  { %1426 = vrcp.f32 %v1062_v38 }
 0x4e4   :  { %v1421_v39 = vpop.eup %1420 }
 0x4e5   :  { %v1064_v40 = vmul.f32 %v1421_v39, %v1413_v31 }
 0x4e7   :  { %1072 = vst.msk [vmem:[%s1678_s9] sm:$0xff] %vm1071_vm1, %v1064_v40 }
 0x4e8   :  { %v1423_v41 = vpop.eup %1422 }
 0x4e9   :  { %v1425_v42 = vpop.eup %1424  ;;  %v1066_v43 = vmul.f32 %v1423_v41, %v1417_v33 }
 0x4ea   :  { %v1068_v44 = vmul.f32 %v1425_v42, %v1415_v32 }
 0x4eb   :  { %1073 = vst.msk [vmem:[%s1678_s9 + $0x8] sm:$0xff] %vm1071_vm1, %v1066_v43 }
 0x4ec   :  { %v1427_v45 = vpop.eup %1426  ;;  %1074 = vst.msk [vmem:[%s1678_s9 + $0x10] sm:$0xff] %vm1071_vm1, %v1068_v44 }
 0x4ed   :  { %v1070_v46 = vmul.f32 %v1427_v45, %v1419_v34 }
 0x4ef   :  { %1075 = vst.msk [vmem:[%s1678_s9 + $0x18] sm:$0xff] %vm1071_vm1, %v1070_v46 }
 0x4f0   :  { %1080 = vsyncpa [#allocation3], 1 }
 0x4f1   :  { %1081 = vsyncpa [#allocation5], 1 }
 0x4f2   :  { %1082 = vsyncpa [#allocation8], 1 }
 0x4f3   :  { %1083 = vsyncpa [#allocation11], 1 }

</bundles_post_ra>
